<compile_context>
chip_gen: v5e
topology: v5e:2x2
jax: 0.10.0
libtpu: 0.0.40
codegen_flags: <defaults>
</compile_context>

<pallas_src>
import jax
import jax.numpy as jnp
from jax.experimental import pallas as pl
from jax.experimental.pallas import tpu as pltpu

_LANES = 128
_SUBLANES = 8
# Target for total pipelined VMEM (2 input + 2 output buffers): safe under the
# 16 MiB default scoped limit on v5e and far under v7x's 64 MiB physical VMEM.
_VMEM_BUDGET_BYTES = 12 * 1024 * 1024


def _repeat_kernel(x_ref, o_ref):
    # x_ref: (block_b, 1, F)   o_ref: (block_b, block_n, F)
    # Replicate the single dim-1 row block_n times (sublane-direction
    # broadcast).  Pure data movement; no arithmetic.
    o_ref[...] = jnp.broadcast_to(x_ref[...], o_ref.shape)


def pallas_repeat_vector(x: jnp.ndarray, n: int) -> jnp.ndarray:
    """Equivalent of torch `x.repeat(1, n, 1)` (requires x.ndim <= 3)."""
    assert x.ndim <= 3, "RepeatVector: x.repeat(1, n, 1) requires ndim <= 3"
    n = int(n)

    # torch.repeat left-pads the shape with 1s up to the number of repeat args.
    x3 = x.reshape((1,) * (3 - x.ndim) + x.shape)
    B, T, D = x3.shape

    # Degenerate / no-copy fast paths.
    if n == 0 or x3.size == 0:
        return jnp.zeros((B, n * T, D), dtype=x.dtype)
    if n == 1:
        return x3  # repeating once duplicates nothing

    F = T * D
    x_in = x3.reshape(B, 1, F)  # metadata-only row-major reshape
    itemsize = jnp.dtype(x.dtype).itemsize

    # Per-block VMEM footprint, accounting for lane padding and dtype-aware
    # sublane packing (8 rows f32, 16 rows bf16, 32 rows int8 per tile).
    lane_pad = pl.cdiv(F, _LANES) * _LANES
    packing = max(1, 4 // itemsize)
    sub_tile = _SUBLANES * packing

    def slab_bytes_per_batch(bn):
        in_rows = sub_tile                              # (1, F) pads to one tile
        out_rows = pl.cdiv(bn, sub_tile) * sub_tile
        return (in_rows + out_rows) * lane_pad * itemsize

    # Choose the n-axis block: full n if one batch row's slab fits the budget,
    # otherwise the largest sublane-tile multiple that does (>= sub_tile).
    if 2 * slab_bytes_per_batch(n) <= _VMEM_BUDGET_BYTES:
        block_n = n
    else:
        max_out_rows = _VMEM_BUDGET_BYTES // (2 * lane_pad * itemsize) - sub_tile
        max_out_rows = max(sub_tile, (max_out_rows // sub_tile) * sub_tile)
        block_n = int(min(n, max_out_rows))
        if block_n < n:  # keep the sublane-dim block 8-multiple aligned
            block_n = max(sub_tile, (block_n // sub_tile) * sub_tile)

    per_b_bytes = slab_bytes_per_batch(block_n)

    # Biggest batch block whose 2-in + 2-out pipeline buffers fit the budget.
    # The leading block dim has no (8,128) constraint and a cdiv grid masks
    # the ragged tail -- no divisor search, no padding.
    block_b = int(min(B, max(1, _VMEM_BUDGET_BYTES // (2 * per_b_bytes))))
    grid = (pl.cdiv(B, block_b), pl.cdiv(n, block_n))

    needed = 2 * block_b * per_b_bytes + (2 << 20)      # + headroom
    vmem_limit = int(min(max(needed, 16 << 20), 64 << 20))

    out = pl.pallas_call(
        _repeat_kernel,
        out_shape=jax.ShapeDtypeStruct((B, n, F), x.dtype),
        grid=grid,
        in_specs=[pl.BlockSpec((block_b, 1, F), lambda i, j: (i, 0, 0))],
        out_specs=pl.BlockSpec((block_b, block_n, F), lambda i, j: (i, j, 0)),
        compiler_params=pltpu.CompilerParams(
            dimension_semantics=("parallel", "parallel"),
            vmem_limit_bytes=vmem_limit,
        ),
    )(x_in)

    # (B, n, T*D) -> (B, n*T, D) is a contiguous, metadata-only reshape and
    # matches torch.cat([x]*n, dim=1) element order exactly.
    return out.reshape(B, n * T, D)


class RepeatVector:
    """Mirror of the PyTorch nn.Module: repeats the input n times along dim 1."""

    def __init__(self, n):
        self.n = int(n)

    def __call__(self, x):
        return pallas_repeat_vector(x, self.n)


if __name__ == "__main__":
    key = jax.random.PRNGKey(0)
    k1, k2 = jax.random.split(key)

    # Typical RepeatVector usage in the GAN: per-batch feature vector repeated
    # n times along the sequence axis.  (B=2, T=1, D=32) -> (2, 8, 32).
    x = jax.random.normal(k1, (2, 1, 32), dtype=jnp.float32)
    n = 8
    y = RepeatVector(n)(x)
    y = jax.block_until_ready(y)
    ref = jnp.tile(x, (1, n, 1))            # == torch x.repeat(1, n, 1)
    assert y.shape == ref.shape and y.dtype == ref.dtype
    assert bool(jnp.all(y == ref))

    # Also exercise T > 1 (the whole dim-1 block is tiled) and bf16 layout.
    x2 = jax.random.normal(k2, (2, 8, 32), dtype=jnp.bfloat16)
    y2 = jax.block_until_ready(RepeatVector(3)(x2))
    ref2 = jnp.tile(x2, (1, 3, 1))
    assert y2.shape == (2, 24, 32) and y2.dtype == ref2.dtype
    assert bool(jnp.all(y2 == ref2))

    print("KERNEL_OK")
</pallas_src>

<mosaic_0001>
module attributes {stable_mosaic.version = 11 : i64} {
  func.func @_repeat_kernel(%arg0: i32, %arg1: i32, %arg2: memref<2x1x32xf32, #tpu.memory_space<vmem>>, %arg3: memref<2x8x32xf32, #tpu.memory_space<vmem>>) attributes {dimension_semantics = [#tpu.dimension_semantics<parallel>, #tpu.dimension_semantics<parallel>], iteration_bounds = array<i64: 1, 1>, scalar_prefetch = 0 : i64, scratch_operands = 0 : i64, tpu.core_type = #tpu.core_type<tc>, window_params = [{transform_indices = @transform_0, window_bounds = array<i64: 2, 1, 32>}, {transform_indices = @transform_1, window_bounds = array<i64: 2, 8, 32>}]} {
    %c0 = arith.constant 0 : index
    %c0_0 = arith.constant 0 : index
    %c0_1 = arith.constant 0 : index
    %0 = vector.load %arg2[%c0, %c0_0, %c0_1] : memref<2x1x32xf32, #tpu.memory_space<vmem>>, vector<2x1x32xf32>
    %1 = vector.shape_cast %0 : vector<2x1x32xf32> to vector<2x1x32xf32>
    %2 = vector.broadcast %1 : vector<2x1x32xf32> to vector<2x8x32xf32>
    %c0_2 = arith.constant 0 : index
    %c0_3 = arith.constant 0 : index
    %c0_4 = arith.constant 0 : index
    %3 = vector.load %arg3[%c0_2, %c0_3, %c0_4] : memref<2x8x32xf32, #tpu.memory_space<vmem>>, vector<2x8x32xf32>
    tpu.vector_store %arg3[%c0_2, %c0_3, %c0_4], %2 {strides = array<i32>} : memref<2x8x32xf32, #tpu.memory_space<vmem>>, vector<2x8x32xf32>,
    return
  }
  func.func @transform_0(%arg0: i32, %arg1: i32) -> (i32, i32, i32) {
    %c0_i32 = arith.constant 0 : i32
    %c0_i32_0 = arith.constant 0 : i32
    %c0_i32_1 = arith.constant 0 : i32
    return %arg0, %c0_i32, %c0_i32_0 : i32, i32, i32
  }
  func.func @transform_1(%arg0: i32, %arg1: i32) -> (i32, i32, i32) {
    %c0_i32 = arith.constant 0 : i32
    %c0_i32_0 = arith.constant 0 : i32
    return %arg0, %arg1, %c0_i32 : i32, i32, i32
  }
}

</mosaic_0001>

<bundles_post_ra>
// kernel: tpu_custom_call.1
= control target key start
LH: loop header
LB: loop body
LE: loop exit
PB: predicated region body
PF: predicated region fallthrough
CT: control target
= control target key end

     0   :  { %6 = vsyncpa [#allocation3], 0  ;;  %s137_s0 = inlined_call_operand.hbm [shape: f32[2,1,32], index: 0, kind: input, shape index: {}]   ;;  %s138_s1 = inlined_call_operand.hbm [shape: f32[2,8,32], index: 1, kind: output, shape index: {}]  }
   0x1   :  { %7 = vsyncpa [#allocation4], 0  ;;  %s12_s8 = sshll.u32 %s137_s0, 4  ;;  %s115_s9 = smov [#allocation2]   ;;  %s13_s8 = int_to_ptr.hbm [resolvable:$true] %s12_s8 }
   0x2   :  { %s14_s10 = sshll.u32 %s115_s9, 4  ;;  %s116_s11 = smov 16   ;;  %s15_s10 = int_to_ptr.vmem [resolvable:$true] %s14_s10 }
   0x3   :  { %s117_s12 = smov 1  }
   0x4   :  { %20 = dma.hbm_to_vmem [thread:$0]  %s13_s8, 32, %s15_s10, [#allocation3], %s116_s11, %s116_s11, %s117_s12  }
   0x5   :  { %111 = dma.done.wait [#allocation3], 32  }
   0x6   :  { %112 = vsyncadd [#allocation3], 4294967264  ;;  %s118_s13 = smov [#allocation5]   ;;  %s42_s17 = sshll.u32 %s138_s1, 4  ;;  %vm33_vm0 = vcmask 261120   ;;  %s43_s17 = int_to_ptr.hbm [resolvable:$true] %s42_s17 }
   0x7   :  { %s40_s14 = sshll.u32 %s118_s13, 4  ;;  %v61_v0 = vld [vmem:[#allocation2] ss:$0 sm:$0xff]  ;;  %v62_v1 = vld [vmem:[#allocation2 + $0x1] ss:$0 sm:$0xff]  ;;  %s119_s0 = smov 128   ;;  %s41_s14 = int_to_ptr.vmem [resolvable:$true] %s40_s14 }
   0x8   :  { %34 = vst.msk [vmem:[#allocation5] sm:$0xff] %vm33_vm0, %v61_v0  ;;  %s120_s18 = smov 8  }
   0x9   :  { %35 = vst.msk [vmem:[#allocation5 + $0x8] sm:$0xff] %vm33_vm0, %v62_v1 }
   0xa   :  { %48 = dma.vmem_to_hbm [thread:$0]  %s41_s14, 256, %s43_s17, [#allocation4], %s119_s0, %s119_s0, %s120_s18  }
   0xb   :  { %113 = dma.done.wait [#allocation4], 256  }
   0xc   :  { %114 = vsyncadd [#allocation4], 4294967040 }
   0xd   :  { %53 = vsyncpa [#allocation3], 1 }
   0xe   :  { %54 = vsyncpa [#allocation4], 1 }

</bundles_post_ra>
